<compile_context>
chip_gen: v6e
topology: v6e:2x2x1
jax: 0.10.0
libtpu: 0.0.40
codegen_flags: <defaults>
</compile_context>

<pallas_src>
import jax
import jax.numpy as jnp
from jax.experimental import pallas as pl
from jax.experimental.pallas import tpu as pltpu  # noqa: F401  (TPU backend)


def _round_up(v, m):
    return ((v + m - 1) // m) * m


def _fused_mlp_kernel(*refs):
    """refs = (x_ref, w0_ref, b0_ref, w1_ref, b1_ref, ..., o_ref).

    Computes: h = x @ W0 + b0; for each following layer: h = relu(h) @ Wi + bi.
    All intermediates stay as f32 values in VMEM/vregs — no HBM round-trips.
    """
    x_ref = refs[0]
    o_ref = refs[-1]
    wb_refs = refs[1:-1]

    h = x_ref[...]
    for i in range(0, len(wb_refs), 2):
        w_ref = wb_refs[i]
        b_ref = wb_refs[i + 1]
        if i > 0:
            h = jnp.maximum(h, 0.0)  # ReLU on the *input* of layers 1..L-1
        h = jnp.dot(h, w_ref[...], preferred_element_type=jnp.float32) + b_ref[...]
    o_ref[...] = h.astype(o_ref.dtype)


def mlp_fused(x, params):
    """Single fused Pallas call for the whole MLP.

    x:      (M, K0) float32
    params: list of (W_t, b) with W_t: (K_i, N_i), b: (1, N_i)
    returns (M, N_last) float32
    """
    m, k0 = x.shape
    m_pad = _round_up(m, 8)

    # feature sizes along the chain: [K0, N0, N1, ...]
    dims = [k0] + [w_t.shape[1] for (w_t, _) in params]
    dims_pad = [_round_up(d, 128) for d in dims]

    # Pad batch to sublane multiple and features to lane (128) multiples.
    x_p = jnp.pad(x, ((0, m_pad - m), (0, dims_pad[0] - k0)))

    flat_inputs = [x_p]
    in_specs = [pl.BlockSpec((m_pad, dims_pad[0]), lambda: (0, 0))]
    for li, (w_t, b) in enumerate(params):
        k_in, n_out = w_t.shape
        kp, npad = dims_pad[li], dims_pad[li + 1]
        w_p = jnp.pad(w_t, ((0, kp - k_in), (0, npad - n_out)))
        b_p = jnp.pad(b, ((0, 0), (0, npad - n_out)))
        flat_inputs.append(w_p)
        flat_inputs.append(b_p)
        in_specs.append(pl.BlockSpec((kp, npad), lambda: (0, 0)))
        in_specs.append(pl.BlockSpec((1, npad), lambda: (0, 0)))

    n_out_pad = dims_pad[-1]
    out_p = pl.pallas_call(
        _fused_mlp_kernel,
        out_shape=jax.ShapeDtypeStruct((m_pad, n_out_pad), x.dtype),
        in_specs=in_specs,
        out_specs=pl.BlockSpec((m_pad, n_out_pad), lambda: (0, 0)),
    )(*flat_inputs)

    # Slice back to the true (unpadded) output shape.
    return out_p[:m, : dims[-1]]


def init_mlp_params(key, num_layers, input_dim, hidden_dim, output_dim):
    """Deterministic init mirroring torch.nn.Linear's default U(-1/sqrt(in), 1/sqrt(in))."""
    layer_sizes = [hidden_dim] * num_layers
    in_dims = [input_dim] + layer_sizes
    out_dims = layer_sizes + [output_dim]
    params = []
    for idim, odim in zip(in_dims, out_dims):
        key, wk, bk = jax.random.split(key, 3)
        bound = 1.0 / (idim ** 0.5)
        # weight stored already transposed: (in, out)
        w_t = jax.random.uniform(wk, (idim, odim), jnp.float32, -bound, bound)
        b = jax.random.uniform(bk, (1, odim), jnp.float32, -bound, bound)
        params.append((w_t, b))
    return params


@jax.jit
def mlp_forward(x, params):
    # torch forward semantics:
    #   x = layers[0](x)
    #   for l in layers[1:]: x = l(relu(x))
    # — fully fused into one Pallas kernel.
    return mlp_fused(x, params)


def mlp_reference(x, params):
    """Pure-JAX reference for correctness checking."""
    w_t, b = params[0]
    x = x @ w_t + b
    for w_t, b in params[1:]:
        x = jnp.maximum(x, 0.0) @ w_t + b
    return x


if __name__ == "__main__":
    num_layers = 3
    input_dim = 32
    hidden_dim = 32
    output_dim = 16
    batch = 8

    key = jax.random.PRNGKey(0)
    key, xk = jax.random.split(key)
    x = jax.random.normal(xk, (batch, input_dim), jnp.float32)
    params = init_mlp_params(key, num_layers, input_dim, hidden_dim, output_dim)

    out = mlp_forward(x, params)
    jax.block_until_ready(out)

    ref = mlp_reference(x, params)
    assert out.shape == (batch, output_dim)
    assert jnp.allclose(out, ref, atol=1e-5, rtol=1e-5)

    print("KERNEL_OK")
</pallas_src>

<mosaic_0001>
module attributes {stable_mosaic.version = 11 : i64} {
  func.func @_fused_mlp_kernel(%arg0: memref<8x128xf32, #tpu.memory_space<vmem>>, %arg1: memref<128x128xf32, #tpu.memory_space<vmem>>, %arg2: memref<1x128xf32, #tpu.memory_space<vmem>>, %arg3: memref<128x128xf32, #tpu.memory_space<vmem>>, %arg4: memref<1x128xf32, #tpu.memory_space<vmem>>, %arg5: memref<128x128xf32, #tpu.memory_space<vmem>>, %arg6: memref<1x128xf32, #tpu.memory_space<vmem>>, %arg7: memref<128x128xf32, #tpu.memory_space<vmem>>, %arg8: memref<1x128xf32, #tpu.memory_space<vmem>>, %arg9: memref<8x128xf32, #tpu.memory_space<vmem>>) attributes {dimension_semantics = [], scalar_prefetch = 0 : i64, scratch_operands = 0 : i64, tpu.core_type = #tpu.core_type<tc>} {
    %c0 = arith.constant 0 : index
    %c0_0 = arith.constant 0 : index
    %0 = vector.load %arg0[%c0, %c0_0] : memref<8x128xf32, #tpu.memory_space<vmem>>, vector<8x128xf32>
    %c0_1 = arith.constant 0 : index
    %c0_2 = arith.constant 0 : index
    %1 = vector.load %arg1[%c0_1, %c0_2] : memref<128x128xf32, #tpu.memory_space<vmem>>, vector<128x128xf32>
    %cst = arith.constant dense<0.000000e+00> : vector<8x128xf32>
    %2 = tpu.matmul %0, %1, %cst {dimension_numbers = #tpu.dot_dimension_numbers<[1], [0], [0], [1], [0, 0, 1, 1], [], []>} : vector<8x128xf32>, vector<128x128xf32>, vector<8x128xf32> -> vector<8x128xf32>
    %c0_3 = arith.constant 0 : index
    %c0_4 = arith.constant 0 : index
    %3 = vector.load %arg2[%c0_3, %c0_4] : memref<1x128xf32, #tpu.memory_space<vmem>>, vector<1x128xf32>
    %4 = vector.broadcast %3 : vector<1x128xf32> to vector<8x128xf32>
    %5 = arith.addf %2, %4 : vector<8x128xf32>
    %cst_5 = arith.constant 0.000000e+00 : f32
    %6 = vector.broadcast %cst_5 : f32 to vector<8x128xf32>
    %7 = arith.maximumf %5, %6 : vector<8x128xf32>
    %c0_6 = arith.constant 0 : index
    %c0_7 = arith.constant 0 : index
    %8 = vector.load %arg3[%c0_6, %c0_7] : memref<128x128xf32, #tpu.memory_space<vmem>>, vector<128x128xf32>
    %cst_8 = arith.constant dense<0.000000e+00> : vector<8x128xf32>
    %9 = tpu.matmul %7, %8, %cst_8 {dimension_numbers = #tpu.dot_dimension_numbers<[1], [0], [0], [1], [0, 0, 1, 1], [], []>} : vector<8x128xf32>, vector<128x128xf32>, vector<8x128xf32> -> vector<8x128xf32>
    %c0_9 = arith.constant 0 : index
    %c0_10 = arith.constant 0 : index
    %10 = vector.load %arg4[%c0_9, %c0_10] : memref<1x128xf32, #tpu.memory_space<vmem>>, vector<1x128xf32>
    %11 = vector.broadcast %10 : vector<1x128xf32> to vector<8x128xf32>
    %12 = arith.addf %9, %11 : vector<8x128xf32>
    %cst_11 = arith.constant 0.000000e+00 : f32
    %13 = vector.broadcast %cst_11 : f32 to vector<8x128xf32>
    %14 = arith.maximumf %12, %13 : vector<8x128xf32>
    %c0_12 = arith.constant 0 : index
    %c0_13 = arith.constant 0 : index
    %15 = vector.load %arg5[%c0_12, %c0_13] : memref<128x128xf32, #tpu.memory_space<vmem>>, vector<128x128xf32>
    %cst_14 = arith.constant dense<0.000000e+00> : vector<8x128xf32>
    %16 = tpu.matmul %14, %15, %cst_14 {dimension_numbers = #tpu.dot_dimension_numbers<[1], [0], [0], [1], [0, 0, 1, 1], [], []>} : vector<8x128xf32>, vector<128x128xf32>, vector<8x128xf32> -> vector<8x128xf32>
    %c0_15 = arith.constant 0 : index
    %c0_16 = arith.constant 0 : index
    %17 = vector.load %arg6[%c0_15, %c0_16] : memref<1x128xf32, #tpu.memory_space<vmem>>, vector<1x128xf32>
    %18 = vector.broadcast %17 : vector<1x128xf32> to vector<8x128xf32>
    %19 = arith.addf %16, %18 : vector<8x128xf32>
    %cst_17 = arith.constant 0.000000e+00 : f32
    %20 = vector.broadcast %cst_17 : f32 to vector<8x128xf32>
    %21 = arith.maximumf %19, %20 : vector<8x128xf32>
    %c0_18 = arith.constant 0 : index
    %c0_19 = arith.constant 0 : index
    %22 = vector.load %arg7[%c0_18, %c0_19] : memref<128x128xf32, #tpu.memory_space<vmem>>, vector<128x128xf32>
    %cst_20 = arith.constant dense<0.000000e+00> : vector<8x128xf32>
    %23 = tpu.matmul %21, %22, %cst_20 {dimension_numbers = #tpu.dot_dimension_numbers<[1], [0], [0], [1], [0, 0, 1, 1], [], []>} : vector<8x128xf32>, vector<128x128xf32>, vector<8x128xf32> -> vector<8x128xf32>
    %c0_21 = arith.constant 0 : index
    %c0_22 = arith.constant 0 : index
    %24 = vector.load %arg8[%c0_21, %c0_22] : memref<1x128xf32, #tpu.memory_space<vmem>>, vector<1x128xf32>
    %25 = vector.broadcast %24 : vector<1x128xf32> to vector<8x128xf32>
    %26 = arith.addf %23, %25 : vector<8x128xf32>
    %c0_23 = arith.constant 0 : index
    %c0_24 = arith.constant 0 : index
    %27 = vector.load %arg9[%c0_23, %c0_24] : memref<8x128xf32, #tpu.memory_space<vmem>>, vector<8x128xf32>
    tpu.vector_store %arg9[%c0_23, %c0_24], %26 {strides = array<i32>} : memref<8x128xf32, #tpu.memory_space<vmem>>, vector<8x128xf32>,
    return
  }
}

</mosaic_0001>

<bundles_post_ra>
// kernel: mlp_forward.1
= control target key start
LH: loop header
LB: loop body
LE: loop exit
PB: predicated region body
PF: predicated region fallthrough
CT: control target
= control target key end

     0   :  { %v661_v1 = vmov 0.0   ;;  %vm662_vm0 = vmmov 0   ;;  %s996_s0 = inlined_call_operand.vmem [shape: f32[8,128], index: 0, kind: input, shape index: {}]   ;;  %s997_s1 = inlined_call_operand.vmem [shape: f32[128,128], index: 1, kind: input, shape index: {}]   ;;  %s998_s2 = inlined_call_operand.vmem [shape: f32[1,128], index: 2, kind: input, shape index: {}]   ;;  %s999_s3 = inlined_call_operand.vmem [shape: f32[128,128], index: 3, kind: input, shape index: {}]   ;;  %s1000_s4 = inlined_call_operand.vmem [shape: f32[1,128], index: 4, kind: input, shape index: {}]   ;;  %s1001_s5 = inlined_call_operand.vmem [shape: f32[128,128], index: 5, kind: input, shape index: {}]   ;;  %s1002_s6 = inlined_call_operand.vmem [shape: f32[1,128], index: 6, kind: input, shape index: {}]   ;;  %s1003_s7 = inlined_call_operand.vmem [shape: f32[128,128], index: 7, kind: input, shape index: {}]   ;;  %s1004_s8 = inlined_call_operand.vmem [shape: f32[1,128], index: 8, kind: input, shape index: {}]   ;;  %s1005_s9 = inlined_call_operand.hbm [shape: f32[8,128], index: 9, kind: output, shape index: {}]  }
   0x1   :  { %v49_v0 = vld [vmem:[%s997_s1 + $0x78] sm:$0xff]  ;;  %496 = vmatprep.subr.mxu0 %v661_v1  ;;  %v48_v2 = vld [vmem:[%s997_s1 + $0x70] sm:$0xff]  ;;  %528 = vmatprep.mubr.msk.f32.mxu0 %vm662_vm0, %v661_v1  ;;  %v47_v3 = vld [vmem:[%s997_s1 + $0x68] sm:$0xff] }
   0x2   :  { %497 = vmatpush3.msra.mxu0 %v49_v0  ;;  %531 = vmatprep.subr.mxu1 %v661_v1  ;;  %v46_v4 = vld [vmem:[%s997_s1 + $0x60] sm:$0xff]  ;;  %v143_v5 = vld [vmem:[%s999_s3 + $0x78] sm:$0xff]  ;;  %v142_v6 = vld [vmem:[%s999_s3 + $0x70] sm:$0xff] }
   0x3   :  { %498 = vmatprep.subr.mxu0 %v661_v1  ;;  %563 = vmatprep.mubr.msk.f32.mxu1 %vm662_vm0, %v661_v1  ;;  %v45_v7 = vld [vmem:[%s997_s1 + $0x58] sm:$0xff]  ;;  %v141_v8 = vld [vmem:[%s999_s3 + $0x68] sm:$0xff]  ;;  %v44_v9 = vld [vmem:[%s997_s1 + $0x50] sm:$0xff] }
   0x4   :  { %499 = vmatpush3.msra.mxu0 %v48_v2  ;;  %532 = vmatpush3.msra.mxu1 %v143_v5  ;;  %v140_v10 = vld [vmem:[%s999_s3 + $0x60] sm:$0xff] }
   0x5   :  { %500 = vmatprep.subr.mxu0 %v661_v1  ;;  %533 = vmatprep.subr.mxu1 %v661_v1 }
   0x6   :  { %501 = vmatpush3.msra.mxu0 %v47_v3  ;;  %534 = vmatpush3.msra.mxu1 %v142_v6 }
   0x7   :  { %502 = vmatprep.subr.mxu0 %v661_v1  ;;  %535 = vmatprep.subr.mxu1 %v661_v1 }
   0x8   :  { %503 = vmatpush3.msra.mxu0 %v46_v4  ;;  %536 = vmatpush3.msra.mxu1 %v141_v8 }
   0x9   :  { %504 = vmatprep.subr.mxu0 %v661_v1 }
   0xa   :  { %505 = vmatpush3.msra.mxu0 %v45_v7 }
   0xb   :  { %14 = vsyncpa [#allocation3], 0  ;;  %506 = vmatprep.subr.mxu0 %v661_v1  ;;  %v43_v11 = vld [vmem:[%s997_s1 + $0x48] sm:$0xff]  ;;  %537 = vmatprep.subr.mxu1 %v661_v1  ;;  %v139_v12 = vld [vmem:[%s999_s3 + $0x58] sm:$0xff]  ;;  %s663_s27 = smov [#allocation2]  }
   0xc   :  { %507 = vmatpush3.msra.mxu0 %v44_v9  ;;  %538 = vmatpush3.msra.mxu1 %v140_v10  ;;  %v42_v13 = vld [vmem:[%s997_s1 + $0x40] sm:$0xff]  ;;  %v138_v14 = vld [vmem:[%s999_s3 + $0x50] sm:$0xff]  ;;  %v41_v15 = vld [vmem:[%s997_s1 + $0x38] sm:$0xff] }
   0xd   :  { %508 = vmatprep.subr.mxu0 %v661_v1  ;;  %539 = vmatprep.subr.mxu1 %v661_v1  ;;  %v137_v16 = vld [vmem:[%s999_s3 + $0x48] sm:$0xff]  ;;  %v40_v17 = vld [vmem:[%s997_s1 + $0x30] sm:$0xff]  ;;  %v136_v18 = vld [vmem:[%s999_s3 + $0x40] sm:$0xff] }
   0xe   :  { %509 = vmatpush3.msra.mxu0 %v43_v11  ;;  %540 = vmatpush3.msra.mxu1 %v139_v12  ;;  %v39_v19 = vld [vmem:[%s997_s1 + $0x28] sm:$0xff]  ;;  %v135_v20 = vld [vmem:[%s999_s3 + $0x38] sm:$0xff]  ;;  %v38_v21 = vld [vmem:[%s997_s1 + $0x20] sm:$0xff] }
   0xf   :  { %510 = vmatprep.subr.mxu0 %v661_v1  ;;  %541 = vmatprep.subr.mxu1 %v661_v1  ;;  %v134_v22 = vld [vmem:[%s999_s3 + $0x30] sm:$0xff]  ;;  %v37_v23 = vld [vmem:[%s997_s1 + $0x18] sm:$0xff]  ;;  %v133_v24 = vld [vmem:[%s999_s3 + $0x28] sm:$0xff] }
  0x10   :  { %511 = vmatpush3.msra.mxu0 %v42_v13  ;;  %542 = vmatpush3.msra.mxu1 %v138_v14  ;;  %v36_v25 = vld [vmem:[%s997_s1 + $0x10] sm:$0xff]  ;;  %v132_v26 = vld [vmem:[%s999_s3 + $0x20] sm:$0xff]  ;;  %v35_v27 = vld [vmem:[%s997_s1 + $0x8] sm:$0xff] }
  0x11   :  { %512 = vmatprep.subr.mxu0 %v661_v1  ;;  %543 = vmatprep.subr.mxu1 %v661_v1  ;;  %v131_v28 = vld [vmem:[%s999_s3 + $0x18] sm:$0xff]  ;;  %v34_v29 = vld [vmem:[%s997_s1] sm:$0xff]  ;;  %v130_v31 = vld [vmem:[%s999_s3 + $0x10] sm:$0xff] }
  0x12   :  { %513 = vmatpush3.msra.mxu0 %v41_v15  ;;  %544 = vmatpush3.msra.mxu1 %v137_v16  ;;  %v33_v30 = vld [vmem:[%s996_s0] sm:$0xff]  ;;  %v129_v32 = vld [vmem:[%s999_s3 + $0x8] sm:$0xff]  ;;  %v237_v34 = vld [vmem:[%s1001_s5 + $0x78] sm:$0xff]  ;;  %s416_s0 = sshll.u32 %s663_s27, 4  ;;  %s417_s0 = int_to_ptr.vmem [resolvable:$true] %s416_s0 }
  0x13   :  { %514 = vmatprep.subr.mxu0 %v661_v1  ;;  %545 = vmatprep.subr.mxu1 %v661_v1  ;;  %v128_v33 = vld [vmem:[%s999_s3] sm:$0xff]  ;;  %v236_v35 = vld [vmem:[%s1001_s5 + $0x70] sm:$0xff]  ;;  %v235_v36 = vld [vmem:[%s1001_s5 + $0x68] sm:$0xff]  ;;  %p644_p1 = scmp.lt.s32.totalorder %s417_s0, %s417_s0 }
  0x14   :  { %515 = vmatpush3.msra.mxu0 %v40_v17  ;;  %546 = vmatpush3.msra.mxu1 %v136_v18  ;;  %v234_v37 = vld [vmem:[%s1001_s5 + $0x60] sm:$0xff]  ;;  %v233_v38 = vld [vmem:[%s1001_s5 + $0x58] sm:$0xff]  ;;  %v232_v39 = vld [vmem:[%s1001_s5 + $0x50] sm:$0xff] }
  0x15   :  { %516 = vmatprep.subr.mxu0 %v661_v1  ;;  %547 = vmatprep.subr.mxu1 %v661_v1  ;;  %v231_v40 = vld [vmem:[%s1001_s5 + $0x48] sm:$0xff]  ;;  %v230_v41 = vld [vmem:[%s1001_s5 + $0x40] sm:$0xff]  ;;  %v229_v42 = vld [vmem:[%s1001_s5 + $0x38] sm:$0xff] }
  0x16   :  { %517 = vmatpush3.msra.mxu0 %v39_v19  ;;  %548 = vmatpush3.msra.mxu1 %v135_v20  ;;  %v228_v43 = vld [vmem:[%s1001_s5 + $0x30] sm:$0xff]  ;;  %v227_v44 = vld [vmem:[%s1001_s5 + $0x28] sm:$0xff]  ;;  %v226_v45 = vld [vmem:[%s1001_s5 + $0x20] sm:$0xff] }
  0x17   :  { %518 = vmatprep.subr.mxu0 %v661_v1  ;;  %549 = vmatprep.subr.mxu1 %v661_v1  ;;  %v225_v46 = vld [vmem:[%s1001_s5 + $0x18] sm:$0xff]  ;;  %v424_v47 = vld [vmem:[%s998_s2] ss:$0 sm:$0xff]  ;;  %v224_v52 = vld [vmem:[%s1001_s5 + $0x10] sm:$0xff] }
  0x18   :  { %519 = vmatpush3.msra.mxu0 %v38_v21  ;;  %550 = vmatpush3.msra.mxu1 %v134_v22  ;;  %v223_v53 = vld [vmem:[%s1001_s5 + $0x8] sm:$0xff]  ;;  %v222_v54 = vld [vmem:[%s1001_s5] sm:$0xff]  ;;  %v331_v55 = vld [vmem:[%s1003_s7 + $0x78] sm:$0xff] }
  0x19   :  { %520 = vmatprep.subr.mxu0 %v661_v1  ;;  %551 = vmatprep.subr.mxu1 %v661_v1  ;;  %v330_v56 = vld [vmem:[%s1003_s7 + $0x70] sm:$0xff]  ;;  %v329_v57 = vld [vmem:[%s1003_s7 + $0x68] sm:$0xff]  ;;  %v328_v58 = vld [vmem:[%s1003_s7 + $0x60] sm:$0xff] }
  0x1a   :  { %521 = vmatpush3.msra.mxu0 %v37_v23  ;;  %552 = vmatpush3.msra.mxu1 %v133_v24  ;;  %v327_v59 = vld [vmem:[%s1003_s7 + $0x58] sm:$0xff]  ;;  %v326_v60 = vld [vmem:[%s1003_s7 + $0x50] sm:$0xff]  ;;  %v325_v61 = vld [vmem:[%s1003_s7 + $0x48] sm:$0xff] }
  0x1b   :  { %522 = vmatprep.subr.mxu0 %v661_v1  ;;  %553 = vmatprep.subr.mxu1 %v661_v1  ;;  %v324_v62 = vld [vmem:[%s1003_s7 + $0x40] sm:$0xff]  ;;  %v323_v63 = vld [vmem:[%s1003_s7 + $0x38] sm:$0xff]  ;;  %v322_v0 = vld [vmem:[%s1003_s7 + $0x30] sm:$0xff] }
  0x1c   :  { %523 = vmatpush3.msra.mxu0 %v36_v25  ;;  %554 = vmatpush3.msra.mxu1 %v132_v26  ;;  %v321_v2 = vld [vmem:[%s1003_s7 + $0x28] sm:$0xff]  ;;  %v320_v3 = vld [vmem:[%s1003_s7 + $0x20] sm:$0xff]  ;;  %v319_v4 = vld [vmem:[%s1003_s7 + $0x18] sm:$0xff] }
  0x1d   :  { %524 = vmatprep.subr.mxu0 %v661_v1  ;;  %555 = vmatprep.subr.mxu1 %v661_v1  ;;  %v425_v5 = vld [vmem:[%s1000_s4] ss:$0 sm:$0xff]  ;;  %v318_v10 = vld [vmem:[%s1003_s7 + $0x10] sm:$0xff]  ;;  %v317_v11 = vld [vmem:[%s1003_s7 + $0x8] sm:$0xff] }
  0x1e   :  { %525 = vmatpush3.msra.mxu0 %v35_v27  ;;  %556 = vmatpush3.msra.mxu1 %v131_v28  ;;  %v316_v12 = vld [vmem:[%s1003_s7] sm:$0xff]  ;;  %s639_s7 = scalar_lea.vmem %s417_s0, 128 }
  0x1f   :  { %526 = vmatprep.subr.mxu0 %v661_v1  ;;  %557 = vmatprep.subr.mxu1 %v661_v1  ;;  %v426_v13 = vld [vmem:[%s1002_s6] ss:$0 sm:$0xff]  ;;  %p640_p0 = scmp.ne.s32.totalorder %s417_s0, %s639_s7  ;;  %p645_p2 = scmp.lt.s32.totalorder %s639_s7, %s639_s7 }
  0x20   :  { %527 = vmatpush3.msra.mxu0 %v34_v29  ;;  %558 = vmatpush3.msra.mxu1 %v130_v31  ;;  %v427_v18 = vld [vmem:[%s1004_s8] ss:$0 sm:$0xff] }
  0x21   :  { %529 = vmatmul.mubr.f32.vlgmr.msra.gmra.mxu0 %v33_v30  ;;  %566 = vmatprep.subr.mxu0 %v661_v1  ;;  %p646_p3 = por %p645_p2, %p644_p1 }
  0x22   :  { %598 = vmatprep.mubr.msk.f32.mxu0 %vm662_vm0, %v661_v1  ;;  %559 = vmatprep.subr.mxu1 %v661_v1 }
  0x23   :  { %560 = vmatpush3.msra.mxu1 %v129_v32  ;;  %567 = vmatpush3.msra.mxu0 %v237_v34  ;;  %p647_p4 = pnand %p646_p3, %p640_p0 }
  0x24   :  { %561 = vmatprep.subr.mxu1 %v661_v1  ;;  %568 = vmatprep.subr.mxu0 %v661_v1 }
  0x25   :  { %562 = vmatpush3.msra.mxu1 %v128_v33  ;;  %569 = vmatpush3.msra.mxu0 %v236_v35 }
  0x26   :  { %601 = vmatprep.subr.mxu1 %v661_v1  ;;  %570 = vmatprep.subr.mxu0 %v661_v1 }
  0x27   :  { %571 = vmatpush3.msra.mxu0 %v235_v36 }
  0x28   :  { %572 = vmatprep.subr.mxu0 %v661_v1 }
  0x29   :  { %573 = vmatpush3.msra.mxu0 %v234_v37 }
  0x2a   :  { %574 = vmatprep.subr.mxu0 %v661_v1 }
  0x2b   :  { %575 = vmatpush3.msra.mxu0 %v233_v38 }
  0x2c   :  { %576 = vmatprep.subr.mxu0 %v661_v1 }
  0x2d   :  { %577 = vmatpush3.msra.mxu0 %v232_v39 }
  0x2e   :  { %578 = vmatprep.subr.mxu0 %v661_v1 }
  0x2f   :  { %579 = vmatpush3.msra.mxu0 %v231_v40 }
  0x30   :  { %580 = vmatprep.subr.mxu0 %v661_v1 }
  0x31   :  { %581 = vmatpush3.msra.mxu0 %v230_v41 }
  0x32   :  { %582 = vmatprep.subr.mxu0 %v661_v1 }
  0x33   :  { %583 = vmatpush3.msra.mxu0 %v229_v42 }
  0x34   :  { %584 = vmatprep.subr.mxu0 %v661_v1 }
  0x35   :  { %585 = vmatpush3.msra.mxu0 %v228_v43 }
  0x36   :  { %586 = vmatprep.subr.mxu0 %v661_v1 }
  0x37   :  { %587 = vmatpush3.msra.mxu0 %v227_v44 }
  0x38   :  { %588 = vmatprep.subr.mxu0 %v661_v1 }
  0x39   :  { %589 = vmatpush3.msra.mxu0 %v226_v45 }
  0x3a   :  { %590 = vmatprep.subr.mxu0 %v661_v1 }
  0x3b   :  { %591 = vmatpush3.msra.mxu0 %v225_v46 }
  0x3c   :  { %592 = vmatprep.subr.mxu0 %v661_v1 }
  0x3d   :  { %593 = vmatpush3.msra.mxu0 %v224_v52 }
  0x3e   :  { %594 = vmatprep.subr.mxu0 %v661_v1 }
  0x3f   :  { %595 = vmatpush3.msra.mxu0 %v223_v53 }
  0x40   :  { %596 = vmatprep.subr.mxu0 %v661_v1 }
  0x41   :  { %597 = vmatpush3.msra.mxu0 %v222_v54 }
  0xe1   :  { %v123_v48 = vpop.f32.mrf.mxu0 }
  0xe2   :  { %v124_v49 = vadd.f32 %v424_v47, %v123_v48 }
  0xe3   :  { %v530_v50 = vpop.f32.mrf.mxu0 }
  0xe4   :  { %v127_v51 = vmax.f32 %v124_v49, 0.0 }
  0xe6   :  { %564 = vmatmul.mubr.f32.vlgmr.msra.gmra.mxu1 %v127_v51 }
  0xe7   :  { %633 = vmatprep.mubr.msk.f32.mxu1 %vm662_vm0, %v661_v1  ;;  %602 = vmatpush3.msra.mxu1 %v331_v55 }
  0xe8   :  { %603 = vmatprep.subr.mxu1 %v661_v1 }
  0xe9   :  { %604 = vmatpush3.msra.mxu1 %v330_v56 }
  0xea   :  { %605 = vmatprep.subr.mxu1 %v661_v1 }
  0xeb   :  { %606 = vmatpush3.msra.mxu1 %v329_v57 }
  0xec   :  { %607 = vmatprep.subr.mxu1 %v661_v1 }
  0xed   :  { %608 = vmatpush3.msra.mxu1 %v328_v58 }
  0xee   :  { %609 = vmatprep.subr.mxu1 %v661_v1 }
  0xef   :  { %610 = vmatpush3.msra.mxu1 %v327_v59 }
  0xf0   :  { %611 = vmatprep.subr.mxu1 %v661_v1 }
  0xf1   :  { %612 = vmatpush3.msra.mxu1 %v326_v60 }
  0xf2   :  { %613 = vmatprep.subr.mxu1 %v661_v1 }
  0xf3   :  { %614 = vmatpush3.msra.mxu1 %v325_v61 }
  0xf4   :  { %615 = vmatprep.subr.mxu1 %v661_v1 }
  0xf5   :  { %616 = vmatpush3.msra.mxu1 %v324_v62 }
  0xf6   :  { %617 = vmatprep.subr.mxu1 %v661_v1 }
  0xf7   :  { %618 = vmatpush3.msra.mxu1 %v323_v63 }
  0xf8   :  { %619 = vmatprep.subr.mxu1 %v661_v1 }
  0xf9   :  { %620 = vmatpush3.msra.mxu1 %v322_v0 }
  0xfa   :  { %621 = vmatprep.subr.mxu1 %v661_v1 }
  0xfb   :  { %622 = vmatpush3.msra.mxu1 %v321_v2 }
  0xfc   :  { %623 = vmatprep.subr.mxu1 %v661_v1 }
  0xfd   :  { %624 = vmatpush3.msra.mxu1 %v320_v3 }
  0xfe   :  { %625 = vmatprep.subr.mxu1 %v661_v1 }
  0xff   :  { %626 = vmatpush3.msra.mxu1 %v319_v4 }
 0x100   :  { %627 = vmatprep.subr.mxu1 %v661_v1 }
 0x101   :  { %628 = vmatpush3.msra.mxu1 %v318_v10 }
 0x102   :  { %629 = vmatprep.subr.mxu1 %v661_v1 }
 0x103   :  { %630 = vmatpush3.msra.mxu1 %v317_v11 }
 0x104   :  { %631 = vmatprep.subr.mxu1 %v661_v1 }
 0x105   :  { %632 = vmatpush3.msra.mxu1 %v316_v12 }
 0x1a6   :  { %v217_v6 = vpop.f32.mrf.mxu1 }
 0x1a7   :  { %v218_v7 = vadd.f32 %v425_v5, %v217_v6 }
 0x1a8   :  { %v565_v8 = vpop.f32.mrf.mxu1 }
 0x1a9   :  { %v221_v9 = vmax.f32 %v218_v7, 0.0 }
 0x1ab   :  { %599 = vmatmul.mubr.f32.vlgmr.msra.gmra.mxu0 %v221_v9 }
 0x26b   :  { %v311_v14 = vpop.f32.mrf.mxu0 }
 0x26c   :  { %v312_v15 = vadd.f32 %v426_v13, %v311_v14 }
 0x26d   :  { %v600_v16 = vpop.f32.mrf.mxu0 }
 0x26e   :  { %v315_v17 = vmax.f32 %v312_v15, 0.0 }
 0x270   :  { %634 = vmatmul.mubr.f32.vlgmr.msra.gmra.mxu1 %v315_v17 }
 0x330   :  { %v405_v1 = vpop.f32.mrf.mxu1 }
 0x331   :  { %v406_v19 = vadd.f32 %v427_v18, %v405_v1 }
 0x332   :  { %v635_v20 = vpop.f32.mrf.mxu1 }
 0x333   :  { %409 = vst [vmem:[#allocation2] sm:$0xff] %v406_v19 }
 0x334   :  { %650 = shalt.err (!%p647_p4)
}
 0x335   :  { %419 = dma.vmem_to_hbm [thread:$0]  %s417_s0, 128, %s1005_s9, [#allocation3]  }
 0x336   :  { %659 = dma.done.wait [#allocation3], 128  }
 0x337   :  { %660 = vsyncadd [#allocation3], 4294967168 }
 0x338   :  { %423 = vsyncpa [#allocation3], 1 }

</bundles_post_ra>
